<compile_context>
chip_gen: v6e
topology: v6e:2x2x1
jax: 0.10.0
libtpu: 0.0.40
codegen_flags: <defaults>
</compile_context>

<pallas_src>
import math

import jax
import jax.numpy as jnp
from jax.experimental import pallas as pl
from jax.experimental.pallas import tpu as pltpu  # noqa: F401  (kept for TPU-specific extensions)

BN_EPS = 1e-5
DROPOUT_P = 0.2
LANE = 128  # pad feature dims to lane width for dense vector loads/stores


def _rup(d):
    return ((d + LANE - 1) // LANE) * LANE


def _pad_2d(a, rows, cols):
    return jnp.pad(a, ((0, rows - a.shape[0]), (0, cols - a.shape[1])))


# ---------------------------------------------------------------------------
# Fused kernel: [Linear -> ReLU -> BatchNorm1d] * n  ->  Dropout -> Linear -> ReLU
# ---------------------------------------------------------------------------
def _block(x, w_ref, p_ref):
    """One MLPBlock on an in-register activation x (B, Dpad_in)."""
    pvec = p_ref[...]                                   # (3, Dpad): bias, gamma, beta
    y = jnp.dot(x, w_ref[...], preferred_element_type=jnp.float32)
    y = jnp.maximum(y + pvec[0:1, :], 0.0)              # bias + ReLU
    mean = jnp.mean(y, axis=0, keepdims=True)           # batch statistics
    diff = y - mean
    var = jnp.mean(diff * diff, axis=0, keepdims=True)  # biased var (torch BN train)
    scale = jax.lax.rsqrt(var + BN_EPS) * pvec[1:2, :]  # fold gamma into inv-std
    return diff * scale + pvec[2:3, :]


def _make_fused_kernel(n_blocks):
    def kernel(*refs):
        n_in = 1 + 2 * n_blocks + 3
        in_refs, out_refs = refs[:n_in], refs[n_in:]
        x = in_refs[0][...]
        for i in range(n_blocks):
            w_ref = in_refs[1 + 2 * i]
            p_ref = in_refs[2 + 2 * i]
            x = _block(x, w_ref, p_ref)
            out_refs[i][...] = x                         # h_i (lane-dense store)
        wo_ref, bo_ref, mask_ref = in_refs[-3], in_refs[-2], in_refs[-1]
        xd = x * mask_ref[...]                           # dropout (pre-scaled mask)
        y = jnp.dot(xd, wo_ref[...], preferred_element_type=jnp.float32) + bo_ref[...]
        out_refs[n_blocks][...] = jnp.maximum(y, 0.0)    # act2 = ReLU
    return kernel


def mlp_forward(params, data, dropout_mask):
    """Single fused pallas_call for the whole forward pass.

    dropout_mask: float32 (B, layer_sizes[-1]) containing keep/(1-p) scaling.
    Returns (final, [h1, h2, h3, final]) matching the PyTorch module.
    """
    blocks = params["blocks"]
    w_out, b_out = params["out"]
    B, d0 = data.shape
    d_hidden = [w.shape[1] for (w, _, _, _) in blocks]
    d_final = w_out.shape[1]

    # Zero-pad every feature dim up to a multiple of 128 (lane-dense layout).
    ins = [_pad_2d(data, B, _rup(d0))]
    for (w, b, g, be) in blocks:
        din, dout = w.shape
        ins.append(_pad_2d(w, _rup(din), _rup(dout)))
        ins.append(_pad_2d(jnp.concatenate([b, g, be], axis=0), 3, _rup(dout)))
    din, dout = w_out.shape
    ins.append(_pad_2d(w_out, _rup(din), _rup(dout)))
    ins.append(_pad_2d(b_out, 1, _rup(dout)))
    ins.append(_pad_2d(dropout_mask, B, _rup(dropout_mask.shape[1])))

    out_shape = tuple(
        jax.ShapeDtypeStruct((B, _rup(d)), jnp.float32) for d in d_hidden
    ) + (jax.ShapeDtypeStruct((B, _rup(d_final)), jnp.float32),)

    res = pl.pallas_call(
        _make_fused_kernel(len(blocks)),
        out_shape=out_shape,
        grid=(1,),
        in_specs=[pl.BlockSpec(a.shape, lambda i: (0, 0)) for a in ins],
        out_specs=tuple(pl.BlockSpec(s.shape, lambda i: (0, 0)) for s in out_shape),
    )(*ins)

    hs = [res[i][:, :d] for i, d in enumerate(d_hidden)]
    final = res[-1][:, :d_final]
    return final, hs + [final]


# ---------------------------------------------------------------------------
# Parameter init (mirrors the torch init schemes in distribution)
# ---------------------------------------------------------------------------
def init_params(key, layer_sizes, output_size):
    blocks = []
    for i in range(len(layer_sizes) - 1):
        din, dout = layer_sizes[i], layer_sizes[i + 1]
        key, kw, kb = jax.random.split(key, 3)
        bound_w = math.sqrt(6.0 / din)            # kaiming_uniform_ (ReLU gain)
        bound_b = 1.0 / math.sqrt(din)            # nn.Linear default bias init
        w = jax.random.uniform(kw, (din, dout), jnp.float32, -bound_w, bound_w)
        b = jax.random.uniform(kb, (1, dout), jnp.float32, -bound_b, bound_b)
        gamma = jnp.ones((1, dout), jnp.float32)  # BN affine weight
        beta = jnp.zeros((1, dout), jnp.float32)  # BN affine bias
        blocks.append((w, b, gamma, beta))
    din, dout = layer_sizes[-1], output_size
    key, kw, kb = jax.random.split(key, 3)
    bound = 1.0 / math.sqrt(din)                  # default nn.Linear init scale
    w_out = jax.random.uniform(kw, (din, dout), jnp.float32, -bound, bound)
    b_out = jax.random.uniform(kb, (1, dout), jnp.float32, -bound, bound)
    return {"blocks": blocks, "out": (w_out, b_out)}


# ---------------------------------------------------------------------------
# Pure-JAX reference (for correctness check)
# ---------------------------------------------------------------------------
def _reference(params, data, dropout_mask):
    x = data
    outs = []
    for (w, b, g, be) in params["blocks"]:
        y = jnp.maximum(x @ w + b, 0.0)
        mean = jnp.mean(y, axis=0, keepdims=True)
        var = jnp.mean((y - mean) ** 2, axis=0, keepdims=True)
        x = (y - mean) / jnp.sqrt(var + BN_EPS) * g + be
        outs.append(x)
    w_out, b_out = params["out"]
    final = jnp.maximum((x * dropout_mask) @ w_out + b_out, 0.0)
    outs.append(final)
    return final, outs


if __name__ == "__main__":
    # Small shapes consistent with the module: batch=8, layer_sizes=[64,32,32,32],
    # output_size=10.
    batch = 8
    layer_sizes = [64, 32, 32, 32]
    output_size = 10

    key = jax.random.PRNGKey(0)
    key, kdata, kdrop = jax.random.split(key, 3)
    data = jax.random.normal(kdata, (batch, layer_sizes[0]), dtype=jnp.float32)
    params = init_params(key, layer_sizes, output_size)

    # Training-mode dropout mask: Bernoulli keep with prob (1-p), scaled 1/(1-p).
    keep = jax.random.bernoulli(kdrop, 1.0 - DROPOUT_P, (batch, layer_sizes[-1]))
    dropout_mask = keep.astype(jnp.float32) * (1.0 / (1.0 - DROPOUT_P))

    x, outputs = mlp_forward(params, data, dropout_mask)
    x = jax.block_until_ready(x)
    outputs = [jax.block_until_ready(o) for o in outputs]

    # Check against a pure-JAX reference (blocks + head, same dropout mask).
    ref_x, ref_outs = _reference(params, data, dropout_mask)
    for got, ref in zip(outputs, ref_outs):
        assert got.shape == ref.shape
        assert jnp.allclose(got, ref, rtol=1e-2, atol=1e-2), "output mismatch"
    assert jnp.allclose(x, ref_x, rtol=1e-2, atol=1e-2), "final mismatch"

    assert x.shape == (batch, output_size)
    assert len(outputs) == len(layer_sizes)  # 3 block outputs + final
    print("KERNEL_OK")
</pallas_src>

<mosaic_0001>
module attributes {stable_mosaic.version = 11 : i64} {
  func.func @kernel(%arg0: i32, %arg1: memref<8x128xf32, #tpu.memory_space<vmem>>, %arg2: memref<128x128xf32, #tpu.memory_space<vmem>>, %arg3: memref<3x128xf32, #tpu.memory_space<vmem>>, %arg4: memref<128x128xf32, #tpu.memory_space<vmem>>, %arg5: memref<3x128xf32, #tpu.memory_space<vmem>>, %arg6: memref<128x128xf32, #tpu.memory_space<vmem>>, %arg7: memref<3x128xf32, #tpu.memory_space<vmem>>, %arg8: memref<128x128xf32, #tpu.memory_space<vmem>>, %arg9: memref<1x128xf32, #tpu.memory_space<vmem>>, %arg10: memref<8x128xf32, #tpu.memory_space<vmem>>, %arg11: memref<8x128xf32, #tpu.memory_space<vmem>>, %arg12: memref<8x128xf32, #tpu.memory_space<vmem>>, %arg13: memref<8x128xf32, #tpu.memory_space<vmem>>, %arg14: memref<8x128xf32, #tpu.memory_space<vmem>>) attributes {dimension_semantics = [#tpu.dimension_semantics<arbitrary>], iteration_bounds = array<i64: 1>, scalar_prefetch = 0 : i64, scratch_operands = 0 : i64, tpu.core_type = #tpu.core_type<tc>, window_params = [{pipeline_mode = #tpu.pipeline_mode<synchronous>, transform_indices = @transform_0, window_bounds = array<i64: 8, 128>}, {pipeline_mode = #tpu.pipeline_mode<synchronous>, transform_indices = @transform_1, window_bounds = array<i64: 128, 128>}, {pipeline_mode = #tpu.pipeline_mode<synchronous>, transform_indices = @transform_2, window_bounds = array<i64: 3, 128>}, {pipeline_mode = #tpu.pipeline_mode<synchronous>, transform_indices = @transform_3, window_bounds = array<i64: 128, 128>}, {pipeline_mode = #tpu.pipeline_mode<synchronous>, transform_indices = @transform_4, window_bounds = array<i64: 3, 128>}, {pipeline_mode = #tpu.pipeline_mode<synchronous>, transform_indices = @transform_5, window_bounds = array<i64: 128, 128>}, {pipeline_mode = #tpu.pipeline_mode<synchronous>, transform_indices = @transform_6, window_bounds = array<i64: 3, 128>}, {pipeline_mode = #tpu.pipeline_mode<synchronous>, transform_indices = @transform_7, window_bounds = array<i64: 128, 128>}, {pipeline_mode = #tpu.pipeline_mode<synchronous>, transform_indices = @transform_8, window_bounds = array<i64: 1, 128>}, {pipeline_mode = #tpu.pipeline_mode<synchronous>, transform_indices = @transform_9, window_bounds = array<i64: 8, 128>}, {pipeline_mode = #tpu.pipeline_mode<synchronous>, transform_indices = @transform_10, window_bounds = array<i64: 8, 128>}, {pipeline_mode = #tpu.pipeline_mode<synchronous>, transform_indices = @transform_11, window_bounds = array<i64: 8, 128>}, {pipeline_mode = #tpu.pipeline_mode<synchronous>, transform_indices = @transform_12, window_bounds = array<i64: 8, 128>}, {pipeline_mode = #tpu.pipeline_mode<synchronous>, transform_indices = @transform_13, window_bounds = array<i64: 8, 128>}]} {
    %c0 = arith.constant 0 : index
    %c0_0 = arith.constant 0 : index
    %0 = vector.load %arg1[%c0, %c0_0] : memref<8x128xf32, #tpu.memory_space<vmem>>, vector<8x128xf32>
    %c0_1 = arith.constant 0 : index
    %c0_2 = arith.constant 0 : index
    %1 = vector.load %arg3[%c0_1, %c0_2] : memref<3x128xf32, #tpu.memory_space<vmem>>, vector<3x128xf32>
    %c0_3 = arith.constant 0 : index
    %c0_4 = arith.constant 0 : index
    %2 = vector.load %arg2[%c0_3, %c0_4] : memref<128x128xf32, #tpu.memory_space<vmem>>, vector<128x128xf32>
    %cst = arith.constant dense<0.000000e+00> : vector<8x128xf32>
    %3 = tpu.matmul %0, %2, %cst {dimension_numbers = #tpu.dot_dimension_numbers<[1], [0], [0], [1], [0, 0, 1, 1], [], []>} : vector<8x128xf32>, vector<128x128xf32>, vector<8x128xf32> -> vector<8x128xf32>
    %4 = vector.extract_strided_slice %1 {offsets = [0, 0], sizes = [1, 128], strides = [1, 1]} : vector<3x128xf32> to vector<1x128xf32>
    %5 = vector.broadcast %4 : vector<1x128xf32> to vector<8x128xf32>
    %6 = arith.addf %3, %5 : vector<8x128xf32>
    %cst_5 = arith.constant 0.000000e+00 : f32
    %7 = vector.broadcast %cst_5 : f32 to vector<8x128xf32>
    %8 = arith.maximumf %6, %7 : vector<8x128xf32>
    %cst_6 = arith.constant dense<0.000000e+00> : vector<128xf32>
    %9 = vector.multi_reduction <add>, %8, %cst_6 [0] : vector<8x128xf32> to vector<128xf32>
    %10 = vector.shape_cast %9 : vector<128xf32> to vector<1x128xf32>
    %cst_7 = arith.constant 8.000000e+00 : f32
    %11 = vector.broadcast %cst_7 : f32 to vector<1x128xf32>
    %12 = arith.divf %10, %11 : vector<1x128xf32>
    %13 = vector.broadcast %12 : vector<1x128xf32> to vector<8x128xf32>
    %14 = arith.subf %8, %13 : vector<8x128xf32>
    %15 = arith.mulf %14, %14 : vector<8x128xf32>
    %cst_8 = arith.constant dense<0.000000e+00> : vector<128xf32>
    %16 = vector.multi_reduction <add>, %15, %cst_8 [0] : vector<8x128xf32> to vector<128xf32>
    %17 = vector.shape_cast %16 : vector<128xf32> to vector<1x128xf32>
    %cst_9 = arith.constant 8.000000e+00 : f32
    %18 = vector.broadcast %cst_9 : f32 to vector<1x128xf32>
    %19 = arith.divf %17, %18 : vector<1x128xf32>
    %cst_10 = arith.constant 9.99999974E-6 : f32
    %20 = vector.broadcast %cst_10 : f32 to vector<1x128xf32>
    %21 = arith.addf %19, %20 : vector<1x128xf32>
    %22 = math.rsqrt %21 : vector<1x128xf32>
    %23 = vector.extract_strided_slice %1 {offsets = [1, 0], sizes = [1, 128], strides = [1, 1]} : vector<3x128xf32> to vector<1x128xf32>
    %24 = arith.mulf %22, %23 : vector<1x128xf32>
    %25 = vector.broadcast %24 : vector<1x128xf32> to vector<8x128xf32>
    %26 = arith.mulf %14, %25 : vector<8x128xf32>
    %27 = vector.extract_strided_slice %1 {offsets = [2, 0], sizes = [1, 128], strides = [1, 1]} : vector<3x128xf32> to vector<1x128xf32>
    %28 = vector.broadcast %27 : vector<1x128xf32> to vector<8x128xf32>
    %29 = arith.addf %26, %28 : vector<8x128xf32>
    %c0_11 = arith.constant 0 : index
    %c0_12 = arith.constant 0 : index
    %30 = vector.load %arg11[%c0_11, %c0_12] : memref<8x128xf32, #tpu.memory_space<vmem>>, vector<8x128xf32>
    tpu.vector_store %arg11[%c0_11, %c0_12], %29 {strides = array<i32>} : memref<8x128xf32, #tpu.memory_space<vmem>>, vector<8x128xf32>,
    %c0_13 = arith.constant 0 : index
    %c0_14 = arith.constant 0 : index
    %31 = vector.load %arg5[%c0_13, %c0_14] : memref<3x128xf32, #tpu.memory_space<vmem>>, vector<3x128xf32>
    %c0_15 = arith.constant 0 : index
    %c0_16 = arith.constant 0 : index
    %32 = vector.load %arg4[%c0_15, %c0_16] : memref<128x128xf32, #tpu.memory_space<vmem>>, vector<128x128xf32>
    %cst_17 = arith.constant dense<0.000000e+00> : vector<8x128xf32>
    %33 = tpu.matmul %29, %32, %cst_17 {dimension_numbers = #tpu.dot_dimension_numbers<[1], [0], [0], [1], [0, 0, 1, 1], [], []>} : vector<8x128xf32>, vector<128x128xf32>, vector<8x128xf32> -> vector<8x128xf32>
    %34 = vector.extract_strided_slice %31 {offsets = [0, 0], sizes = [1, 128], strides = [1, 1]} : vector<3x128xf32> to vector<1x128xf32>
    %35 = vector.broadcast %34 : vector<1x128xf32> to vector<8x128xf32>
    %36 = arith.addf %33, %35 : vector<8x128xf32>
    %cst_18 = arith.constant 0.000000e+00 : f32
    %37 = vector.broadcast %cst_18 : f32 to vector<8x128xf32>
    %38 = arith.maximumf %36, %37 : vector<8x128xf32>
    %cst_19 = arith.constant dense<0.000000e+00> : vector<128xf32>
    %39 = vector.multi_reduction <add>, %38, %cst_19 [0] : vector<8x128xf32> to vector<128xf32>
    %40 = vector.shape_cast %39 : vector<128xf32> to vector<1x128xf32>
    %cst_20 = arith.constant 8.000000e+00 : f32
    %41 = vector.broadcast %cst_20 : f32 to vector<1x128xf32>
    %42 = arith.divf %40, %41 : vector<1x128xf32>
    %43 = vector.broadcast %42 : vector<1x128xf32> to vector<8x128xf32>
    %44 = arith.subf %38, %43 : vector<8x128xf32>
    %45 = arith.mulf %44, %44 : vector<8x128xf32>
    %cst_21 = arith.constant dense<0.000000e+00> : vector<128xf32>
    %46 = vector.multi_reduction <add>, %45, %cst_21 [0] : vector<8x128xf32> to vector<128xf32>
    %47 = vector.shape_cast %46 : vector<128xf32> to vector<1x128xf32>
    %cst_22 = arith.constant 8.000000e+00 : f32
    %48 = vector.broadcast %cst_22 : f32 to vector<1x128xf32>
    %49 = arith.divf %47, %48 : vector<1x128xf32>
    %cst_23 = arith.constant 9.99999974E-6 : f32
    %50 = vector.broadcast %cst_23 : f32 to vector<1x128xf32>
    %51 = arith.addf %49, %50 : vector<1x128xf32>
    %52 = math.rsqrt %51 : vector<1x128xf32>
    %53 = vector.extract_strided_slice %31 {offsets = [1, 0], sizes = [1, 128], strides = [1, 1]} : vector<3x128xf32> to vector<1x128xf32>
    %54 = arith.mulf %52, %53 : vector<1x128xf32>
    %55 = vector.broadcast %54 : vector<1x128xf32> to vector<8x128xf32>
    %56 = arith.mulf %44, %55 : vector<8x128xf32>
    %57 = vector.extract_strided_slice %31 {offsets = [2, 0], sizes = [1, 128], strides = [1, 1]} : vector<3x128xf32> to vector<1x128xf32>
    %58 = vector.broadcast %57 : vector<1x128xf32> to vector<8x128xf32>
    %59 = arith.addf %56, %58 : vector<8x128xf32>
    %c0_24 = arith.constant 0 : index
    %c0_25 = arith.constant 0 : index
    %60 = vector.load %arg12[%c0_24, %c0_25] : memref<8x128xf32, #tpu.memory_space<vmem>>, vector<8x128xf32>
    tpu.vector_store %arg12[%c0_24, %c0_25], %59 {strides = array<i32>} : memref<8x128xf32, #tpu.memory_space<vmem>>, vector<8x128xf32>,
    %c0_26 = arith.constant 0 : index
    %c0_27 = arith.constant 0 : index
    %61 = vector.load %arg7[%c0_26, %c0_27] : memref<3x128xf32, #tpu.memory_space<vmem>>, vector<3x128xf32>
    %c0_28 = arith.constant 0 : index
    %c0_29 = arith.constant 0 : index
    %62 = vector.load %arg6[%c0_28, %c0_29] : memref<128x128xf32, #tpu.memory_space<vmem>>, vector<128x128xf32>
    %cst_30 = arith.constant dense<0.000000e+00> : vector<8x128xf32>
    %63 = tpu.matmul %59, %62, %cst_30 {dimension_numbers = #tpu.dot_dimension_numbers<[1], [0], [0], [1], [0, 0, 1, 1], [], []>} : vector<8x128xf32>, vector<128x128xf32>, vector<8x128xf32> -> vector<8x128xf32>
    %64 = vector.extract_strided_slice %61 {offsets = [0, 0], sizes = [1, 128], strides = [1, 1]} : vector<3x128xf32> to vector<1x128xf32>
    %65 = vector.broadcast %64 : vector<1x128xf32> to vector<8x128xf32>
    %66 = arith.addf %63, %65 : vector<8x128xf32>
    %cst_31 = arith.constant 0.000000e+00 : f32
    %67 = vector.broadcast %cst_31 : f32 to vector<8x128xf32>
    %68 = arith.maximumf %66, %67 : vector<8x128xf32>
    %cst_32 = arith.constant dense<0.000000e+00> : vector<128xf32>
    %69 = vector.multi_reduction <add>, %68, %cst_32 [0] : vector<8x128xf32> to vector<128xf32>
    %70 = vector.shape_cast %69 : vector<128xf32> to vector<1x128xf32>
    %cst_33 = arith.constant 8.000000e+00 : f32
    %71 = vector.broadcast %cst_33 : f32 to vector<1x128xf32>
    %72 = arith.divf %70, %71 : vector<1x128xf32>
    %73 = vector.broadcast %72 : vector<1x128xf32> to vector<8x128xf32>
    %74 = arith.subf %68, %73 : vector<8x128xf32>
    %75 = arith.mulf %74, %74 : vector<8x128xf32>
    %cst_34 = arith.constant dense<0.000000e+00> : vector<128xf32>
    %76 = vector.multi_reduction <add>, %75, %cst_34 [0] : vector<8x128xf32> to vector<128xf32>
    %77 = vector.shape_cast %76 : vector<128xf32> to vector<1x128xf32>
    %cst_35 = arith.constant 8.000000e+00 : f32
    %78 = vector.broadcast %cst_35 : f32 to vector<1x128xf32>
    %79 = arith.divf %77, %78 : vector<1x128xf32>
    %cst_36 = arith.constant 9.99999974E-6 : f32
    %80 = vector.broadcast %cst_36 : f32 to vector<1x128xf32>
    %81 = arith.addf %79, %80 : vector<1x128xf32>
    %82 = math.rsqrt %81 : vector<1x128xf32>
    %83 = vector.extract_strided_slice %61 {offsets = [1, 0], sizes = [1, 128], strides = [1, 1]} : vector<3x128xf32> to vector<1x128xf32>
    %84 = arith.mulf %82, %83 : vector<1x128xf32>
    %85 = vector.broadcast %84 : vector<1x128xf32> to vector<8x128xf32>
    %86 = arith.mulf %74, %85 : vector<8x128xf32>
    %87 = vector.extract_strided_slice %61 {offsets = [2, 0], sizes = [1, 128], strides = [1, 1]} : vector<3x128xf32> to vector<1x128xf32>
    %88 = vector.broadcast %87 : vector<1x128xf32> to vector<8x128xf32>
    %89 = arith.addf %86, %88 : vector<8x128xf32>
    %c0_37 = arith.constant 0 : index
    %c0_38 = arith.constant 0 : index
    %90 = vector.load %arg13[%c0_37, %c0_38] : memref<8x128xf32, #tpu.memory_space<vmem>>, vector<8x128xf32>
    tpu.vector_store %arg13[%c0_37, %c0_38], %89 {strides = array<i32>} : memref<8x128xf32, #tpu.memory_space<vmem>>, vector<8x128xf32>,
    %c0_39 = arith.constant 0 : index
    %c0_40 = arith.constant 0 : index
    %91 = vector.load %arg10[%c0_39, %c0_40] : memref<8x128xf32, #tpu.memory_space<vmem>>, vector<8x128xf32>
    %92 = arith.mulf %89, %91 : vector<8x128xf32>
    %c0_41 = arith.constant 0 : index
    %c0_42 = arith.constant 0 : index
    %93 = vector.load %arg8[%c0_41, %c0_42] : memref<128x128xf32, #tpu.memory_space<vmem>>, vector<128x128xf32>
    %cst_43 = arith.constant dense<0.000000e+00> : vector<8x128xf32>
    %94 = tpu.matmul %92, %93, %cst_43 {dimension_numbers = #tpu.dot_dimension_numbers<[1], [0], [0], [1], [0, 0, 1, 1], [], []>} : vector<8x128xf32>, vector<128x128xf32>, vector<8x128xf32> -> vector<8x128xf32>
    %c0_44 = arith.constant 0 : index
    %c0_45 = arith.constant 0 : index
    %95 = vector.load %arg9[%c0_44, %c0_45] : memref<1x128xf32, #tpu.memory_space<vmem>>, vector<1x128xf32>
    %96 = vector.broadcast %95 : vector<1x128xf32> to vector<8x128xf32>
    %97 = arith.addf %94, %96 : vector<8x128xf32>
    %cst_46 = arith.constant 0.000000e+00 : f32
    %98 = vector.broadcast %cst_46 : f32 to vector<8x128xf32>
    %99 = arith.maximumf %97, %98 : vector<8x128xf32>
    %c0_47 = arith.constant 0 : index
    %c0_48 = arith.constant 0 : index
    %100 = vector.load %arg14[%c0_47, %c0_48] : memref<8x128xf32, #tpu.memory_space<vmem>>, vector<8x128xf32>
    tpu.vector_store %arg14[%c0_47, %c0_48], %99 {strides = array<i32>} : memref<8x128xf32, #tpu.memory_space<vmem>>, vector<8x128xf32>,
    return
  }
  func.func @transform_0(%arg0: i32) -> (i32, i32) {
    %c0_i32 = arith.constant 0 : i32
    %c0_i32_0 = arith.constant 0 : i32
    %c0_i32_1 = arith.constant 0 : i32
    return %c0_i32, %c0_i32_0 : i32, i32
  }
  func.func @transform_1(%arg0: i32) -> (i32, i32) {
    %c0_i32 = arith.constant 0 : i32
    %c0_i32_0 = arith.constant 0 : i32
    %c0_i32_1 = arith.constant 0 : i32
    return %c0_i32, %c0_i32_0 : i32, i32
  }
  func.func @transform_2(%arg0: i32) -> (i32, i32) {
    %c0_i32 = arith.constant 0 : i32
    %c0_i32_0 = arith.constant 0 : i32
    %c0_i32_1 = arith.constant 0 : i32
    return %c0_i32, %c0_i32_0 : i32, i32
  }
  func.func @transform_3(%arg0: i32) -> (i32, i32) {
    %c0_i32 = arith.constant 0 : i32
    %c0_i32_0 = arith.constant 0 : i32
    %c0_i32_1 = arith.constant 0 : i32
    return %c0_i32, %c0_i32_0 : i32, i32
  }
  func.func @transform_4(%arg0: i32) -> (i32, i32) {
    %c0_i32 = arith.constant 0 : i32
    %c0_i32_0 = arith.constant 0 : i32
    %c0_i32_1 = arith.constant 0 : i32
    return %c0_i32, %c0_i32_0 : i32, i32
  }
  func.func @transform_5(%arg0: i32) -> (i32, i32) {
    %c0_i32 = arith.constant 0 : i32
    %c0_i32_0 = arith.constant 0 : i32
    %c0_i32_1 = arith.constant 0 : i32
    return %c0_i32, %c0_i32_0 : i32, i32
  }
  func.func @transform_6(%arg0: i32) -> (i32, i32) {
    %c0_i32 = arith.constant 0 : i32
    %c0_i32_0 = arith.constant 0 : i32
    %c0_i32_1 = arith.constant 0 : i32
    return %c0_i32, %c0_i32_0 : i32, i32
  }
  func.func @transform_7(%arg0: i32) -> (i32, i32) {
    %c0_i32 = arith.constant 0 : i32
    %c0_i32_0 = arith.constant 0 : i32
    %c0_i32_1 = arith.constant 0 : i32
    return %c0_i32, %c0_i32_0 : i32, i32
  }
  func.func @transform_8(%arg0: i32) -> (i32, i32) {
    %c0_i32 = arith.constant 0 : i32
    %c0_i32_0 = arith.constant 0 : i32
    %c0_i32_1 = arith.constant 0 : i32
    return %c0_i32, %c0_i32_0 : i32, i32
  }
  func.func @transform_9(%arg0: i32) -> (i32, i32) {
    %c0_i32 = arith.constant 0 : i32
    %c0_i32_0 = arith.constant 0 : i32
    %c0_i32_1 = arith.constant 0 : i32
    return %c0_i32, %c0_i32_0 : i32, i32
  }
  func.func @transform_10(%arg0: i32) -> (i32, i32) {
    %c0_i32 = arith.constant 0 : i32
    %c0_i32_0 = arith.constant 0 : i32
    %c0_i32_1 = arith.constant 0 : i32
    return %c0_i32, %c0_i32_0 : i32, i32
  }
  func.func @transform_11(%arg0: i32) -> (i32, i32) {
    %c0_i32 = arith.constant 0 : i32
    %c0_i32_0 = arith.constant 0 : i32
    %c0_i32_1 = arith.constant 0 : i32
    return %c0_i32, %c0_i32_0 : i32, i32
  }
  func.func @transform_12(%arg0: i32) -> (i32, i32) {
    %c0_i32 = arith.constant 0 : i32
    %c0_i32_0 = arith.constant 0 : i32
    %c0_i32_1 = arith.constant 0 : i32
    return %c0_i32, %c0_i32_0 : i32, i32
  }
  func.func @transform_13(%arg0: i32) -> (i32, i32) {
    %c0_i32 = arith.constant 0 : i32
    %c0_i32_0 = arith.constant 0 : i32
    %c0_i32_1 = arith.constant 0 : i32
    return %c0_i32, %c0_i32_0 : i32, i32
  }
}

</mosaic_0001>

<bundles_post_ra>
// kernel: tpu_custom_call.1
= control target key start
LH: loop header
LB: loop body
LE: loop exit
PB: predicated region body
PF: predicated region fallthrough
CT: control target
= control target key end

     0   :  { %19 = vsyncpa [#allocation3], 0  ;;  %s1345_s0 = inlined_call_operand.hbm [shape: f32[8,128], index: 0, kind: input, shape index: {}]   ;;  %s1346_s1 = inlined_call_operand.hbm [shape: f32[128,128], index: 1, kind: input, shape index: {}]   ;;  %s1347_s2 = inlined_call_operand.hbm [shape: f32[3,128], index: 2, kind: input, shape index: {}]   ;;  %s1348_s3 = inlined_call_operand.hbm [shape: f32[128,128], index: 3, kind: input, shape index: {}]   ;;  %s1349_s4 = inlined_call_operand.vmem [shape: f32[3,128], index: 4, kind: input, shape index: {}]   ;;  %s1350_s5 = inlined_call_operand.hbm [shape: f32[128,128], index: 5, kind: input, shape index: {}]   ;;  %s1351_s6 = inlined_call_operand.vmem [shape: f32[3,128], index: 6, kind: input, shape index: {}]   ;;  %s1352_s7 = inlined_call_operand.hbm [shape: f32[128,128], index: 7, kind: input, shape index: {}]   ;;  %s1353_s8 = inlined_call_operand.hbm [shape: f32[1,128], index: 8, kind: input, shape index: {}]   ;;  %s1354_s9 = inlined_call_operand.vmem [shape: f32[8,128], index: 9, kind: input, shape index: {}]   ;;  %s1355_s10 = inlined_call_operand.hbm [shape: f32[8,128], index: 10, kind: output, shape index: {0}]   ;;  %s1356_s11 = inlined_call_operand.hbm [shape: f32[8,128], index: 11, kind: output, shape index: {1}]   ;;  %s1357_s12 = inlined_call_operand.hbm [shape: f32[8,128], index: 12, kind: output, shape index: {2}]   ;;  %s1358_s13 = inlined_call_operand.hbm [shape: f32[8,128], index: 13, kind: output, shape index: {3}]  }
   0x1   :  { %20 = vsyncpa [#allocation6], 0 }
   0x2   :  { %21 = vsyncpa [#allocation9], 0 }
   0x3   :  { %22 = vsyncpa [#allocation12], 0 }
   0x4   :  { %23 = vsyncpa [#allocation4], 0 }
   0x5   :  { %24 = vsyncpa [#allocation16], 0 }
   0x6   :  { %25 = vsyncpa [#allocation19], 0  ;;  %s1119_s25 = smov [#allocation5]  }
   0x7   :  { %s41_s26 = sshll.u32 %s1119_s25, 4  ;;  %s42_s26 = int_to_ptr.vmem [resolvable:$true] %s41_s26 }
   0x8   :  { %s893_s27 = scalar_lea.vmem %s42_s26, 2048  ;;  %p898_p1 = scmp.lt.s32.totalorder %s42_s26, %s42_s26 }
   0x9   :  { %p894_p0 = scmp.ne.s32.totalorder %s42_s26, %s893_s27  ;;  %p899_p2 = scmp.lt.s32.totalorder %s893_s27, %s893_s27 }
   0xb   :  { %p900_p3 = por %p899_p2, %p898_p1 }
   0xd   :  { %p901_p4 = pnand %p900_p3, %p894_p0 }
   0xf   :  { %904 = shalt.err (!%p901_p4)
}
  0x10   :  { %s1120_s28 = smov 128   ;;  %s1121_s29 = smov 8  }
  0x11   :  { %47 = dma.hbm_to_vmem [thread:$0]  %s1346_s1, 2048, %s42_s26, [#allocation6], %s1120_s28, %s1120_s28, %s1121_s29  }
  0x12   :  { %s1122_s15 = smov [#allocation8]   ;;  %s1123_s17 = smov [#allocation11]  }
  0x13   :  { %s63_s16 = sshll.u32 %s1122_s15, 4  ;;  %s91_s18 = sshll.u32 %s1123_s17, 4  ;;  %s64_s16 = int_to_ptr.vmem [resolvable:$true] %s63_s16  ;;  %s92_s18 = int_to_ptr.vmem [resolvable:$true] %s91_s18 }
  0x14   :  { %s913_s19 = scalar_lea.vmem %s64_s16, 2048  ;;  %p918_p6 = scmp.lt.s32.totalorder %s64_s16, %s64_s16 }
  0x15   :  { %p914_p5 = scmp.ne.s32.totalorder %s64_s16, %s913_s19  ;;  %p919_p7 = scmp.lt.s32.totalorder %s913_s19, %s913_s19 }
  0x17   :  { %p920_p8 = por %p919_p7, %p918_p6 }
  0x19   :  { %p921_p9 = pnand %p920_p8, %p914_p5 }
  0x1b   :  { %924 = shalt.err (!%p921_p9)
}
  0x1c   :  { %69 = dma.hbm_to_vmem [thread:$0]  %s1348_s3, 2048, %s64_s16, [#allocation9], %s1120_s28, %s1120_s28, %s1121_s29  }
  0x1d   :  { %s933_s1 = scalar_lea.vmem %s92_s18, 2048  ;;  %p938_p11 = scmp.lt.s32.totalorder %s92_s18, %s92_s18 }
  0x1e   :  { %p934_p10 = scmp.ne.s32.totalorder %s92_s18, %s933_s1  ;;  %p939_p12 = scmp.lt.s32.totalorder %s933_s1, %s933_s1 }
  0x20   :  { %p940_p13 = por %p939_p12, %p938_p11 }
  0x22   :  { %p941_p0 = pnand %p940_p13, %p934_p10 }
  0x24   :  { %944 = shalt.err (!%p941_p0)
}
  0x25   :  { %97 = dma.hbm_to_vmem [thread:$0]  %s1352_s7, 2048, %s92_s18, [#allocation12], %s1120_s28, %s1120_s28, %s1121_s29  }
  0x26   :  { %s1124_s24 = smov [#allocation2]   ;;  %s1125_s26 = smov [#allocation7]  }
  0x27   :  { %s32_s25 = sshll.u32 %s1124_s24, 4  ;;  %s54_s3 = sshll.u32 %s1125_s26, 4  ;;  %s33_s25 = int_to_ptr.vmem [resolvable:$true] %s32_s25  ;;  %s55_s3 = int_to_ptr.vmem [resolvable:$true] %s54_s3 }
  0x28   :  { %s953_s27 = scalar_lea.vmem %s33_s25, 128  ;;  %p958_p2 = scmp.lt.s32.totalorder %s33_s25, %s33_s25 }
  0x29   :  { %p954_p1 = scmp.ne.s32.totalorder %s33_s25, %s953_s27  ;;  %p959_p3 = scmp.lt.s32.totalorder %s953_s27, %s953_s27 }
  0x2b   :  { %p960_p4 = por %p959_p3, %p958_p2 }
  0x2d   :  { %p961_p5 = pnand %p960_p4, %p954_p1 }
  0x2f   :  { %964 = shalt.err (!%p961_p5)
}
  0x30   :  { %35 = dma.hbm_to_vmem [thread:$0]  %s1345_s0, 128, %s33_s25, [#allocation3]  }
  0x31   :  { %s973_s15 = scalar_lea.vmem %s55_s3, 64  ;;  %p978_p7 = scmp.lt.s32.totalorder %s55_s3, %s55_s3 }
  0x32   :  { %p974_p6 = scmp.ne.s32.totalorder %s55_s3, %s973_s15  ;;  %p979_p8 = scmp.lt.s32.totalorder %s973_s15, %s973_s15 }
  0x34   :  { %p980_p9 = por %p979_p8, %p978_p7 }
  0x36   :  { %p981_p10 = pnand %p980_p9, %p974_p6 }
  0x38   :  { %984 = shalt.err (!%p981_p10)
}
  0x39   :  { %57 = dma.hbm_to_vmem [thread:$0]  %s1347_s2, 64, %s55_s3, [#allocation6]  }
  0x3a   :  { %s1126_s17 = smov [#allocation10]   ;;  %s1127_s19 = smov [#allocation13]  }
  0x3b   :  { %s77_s18 = sshll.u32 %s1126_s17, 4  ;;  %s104_s20 = sshll.u32 %s1127_s19, 4  ;;  %s78_s18 = int_to_ptr.vmem [resolvable:$true] %s77_s18  ;;  %s105_s20 = int_to_ptr.vmem [resolvable:$true] %s104_s20 }
  0x3c   :  { %s993_s21 = scalar_lea.vmem %s78_s18, 2048  ;;  %p998_p12 = scmp.lt.s32.totalorder %s78_s18, %s78_s18 }
  0x3d   :  { %p994_p11 = scmp.ne.s32.totalorder %s78_s18, %s993_s21  ;;  %p999_p13 = scmp.lt.s32.totalorder %s993_s21, %s993_s21 }
  0x3f   :  { %p1000_p0 = por %p999_p13, %p998_p12 }
  0x41   :  { %p1001_p1 = pnand %p1000_p0, %p994_p11 }
  0x43   :  { %1004 = shalt.err (!%p1001_p1)
}
  0x44   :  { %83 = dma.hbm_to_vmem [thread:$0]  %s1350_s5, 2048, %s78_s18, [#allocation9], %s1120_s28, %s1120_s28, %s1121_s29  }
  0x45   :  { %s1013_s2 = scalar_lea.vmem %s105_s20, 16  ;;  %s1017_s22 = scalar_lea.vmem %s105_s20, 32 }
  0x46   :  { %p1014_p2 = scmp.ne.s32.totalorder %s105_s20, %s1013_s2  ;;  %p1018_p3 = scmp.lt.s32.totalorder %s105_s20, %s105_s20 }
  0x47   :  { %p1019_p4 = scmp.lt.s32.totalorder %s1017_s22, %s1013_s2 }
  0x49   :  { %p1020_p5 = por %p1019_p4, %p1018_p3 }
  0x4b   :  { %p1021_p6 = pnand %p1020_p5, %p1014_p2 }
  0x4d   :  { %1024 = shalt.err (!%p1021_p6)
}
  0x4e   :  { %107 = dma.hbm_to_vmem [thread:$0]  %s1353_s8, 16, %s105_s20, [#allocation12]  }
  0x4f   :  { %1105 = dma.done.wait [#allocation3], 128  }
  0x50   :  { %1106 = vsyncadd [#allocation3], 4294967168 }
  0x51   :  { %1107 = dma.done.wait [#allocation6], 2112  }
  0x52   :  { %1108 = vsyncadd [#allocation6], 4294965184 }
  0x53   :  { %1109 = dma.done.wait [#allocation9], 4096  }
  0x54   :  { %1110 = vsyncadd [#allocation9], 4294963200 }
  0x55   :  { %1111 = dma.done.wait [#allocation12], 2064  }
  0x56   :  { %1112 = vsyncadd [#allocation12], 4294965232  ;;  %v1128_v0 = vmov 0.0   ;;  %vm1129_vm0 = vmmov 0   ;;  %v148_v1 = vld [vmem:[#allocation5 + $0x78] sm:$0xff]  ;;  %v147_v2 = vld [vmem:[#allocation5 + $0x70] sm:$0xff]  ;;  %v149_v34 = vlaneseq }
  0x57   :  { %724 = vmatprep.subr.mxu0 %v1128_v0  ;;  %756 = vmatprep.mubr.msk.f32.mxu0 %vm1129_vm0, %v1128_v0  ;;  %v146_v3 = vld [vmem:[#allocation5 + $0x68] sm:$0xff]  ;;  %v145_v4 = vld [vmem:[#allocation5 + $0x60] sm:$0xff]  ;;  %v144_v5 = vld [vmem:[#allocation5 + $0x58] sm:$0xff]  ;;  %s1130_s25 = smov [#allocation15]   ;;  %s1131_s3 = smov [#allocation14]  }
  0x58   :  { %759 = vmatprep.subr.mxu1 %v1128_v0  ;;  %791 = vmatprep.mubr.msk.f32.mxu1 %vm1129_vm0, %v1128_v0  ;;  %v143_v6 = vld [vmem:[#allocation5 + $0x50] sm:$0xff]  ;;  %v142_v7 = vld [vmem:[#allocation5 + $0x48] sm:$0xff]  ;;  %v141_v8 = vld [vmem:[#allocation5 + $0x40] sm:$0xff]  ;;  %v150_v35 = vshrl.u32 %v149_v34, 7  ;;  %s612_s26 = sshll.u32 %s1130_s25, 4  ;;  %s602_s27 = sshll.u32 %s1131_s3, 4  ;;  %s613_s26 = int_to_ptr.vmem [resolvable:$true] %s612_s26  ;;  %s603_s27 = int_to_ptr.vmem [resolvable:$true] %s602_s27 }
  0x59   :  { %725 = vmatpush3.msra.mxu0 %v148_v1  ;;  %v140_v9 = vld [vmem:[#allocation5 + $0x38] sm:$0xff]  ;;  %v139_v10 = vld [vmem:[#allocation5 + $0x30] sm:$0xff]  ;;  %v138_v11 = vld [vmem:[#allocation5 + $0x28] sm:$0xff]  ;;  %s1025_s30 = scalar_lea.vmem %s613_s26, 128  ;;  %p1030_p8 = scmp.lt.s32.totalorder %s613_s26, %s613_s26 }
  0x5a   :  { %726 = vmatprep.subr.mxu0 %v1128_v0  ;;  %v137_v12 = vld [vmem:[#allocation5 + $0x20] sm:$0xff]  ;;  %v136_v13 = vld [vmem:[#allocation5 + $0x18] sm:$0xff]  ;;  %v135_v14 = vld [vmem:[#allocation5 + $0x10] sm:$0xff]  ;;  %v1277_v36 = vsub.s32 0, %v150_v35  ;;  %v1280_v60 = vsub.s32 1, %v150_v35  ;;  %v1282_v61 = vsub.s32 2, %v150_v35  ;;  %p1026_p7 = scmp.ne.s32.totalorder %s613_s26, %s1025_s30  ;;  %p1031_p9 = scmp.lt.s32.totalorder %s1025_s30, %s1025_s30 }
  0x5b   :  { %727 = vmatpush3.msra.mxu0 %v147_v2  ;;  %v134_v15 = vld [vmem:[#allocation5 + $0x8] sm:$0xff]  ;;  %v133_v16 = vld [vmem:[#allocation5] sm:$0xff]  ;;  %v131_v17 = vld [vmem:[#allocation2] sm:$0xff] }
  0x5c   :  { %728 = vmatprep.subr.mxu0 %v1128_v0  ;;  %v271_v18 = vld [vmem:[#allocation8 + $0x78] sm:$0xff]  ;;  %v270_v19 = vld [vmem:[#allocation8 + $0x70] sm:$0xff]  ;;  %v269_v20 = vld [vmem:[#allocation8 + $0x68] sm:$0xff]  ;;  %p1032_p10 = por %p1031_p9, %p1030_p8 }
  0x5d   :  { %729 = vmatpush3.msra.mxu0 %v146_v3  ;;  %760 = vmatpush3.msra.mxu1 %v271_v18  ;;  %v268_v21 = vld [vmem:[#allocation8 + $0x60] sm:$0xff]  ;;  %v267_v22 = vld [vmem:[#allocation8 + $0x58] sm:$0xff]  ;;  %v266_v23 = vld [vmem:[#allocation8 + $0x50] sm:$0xff] }
  0x5e   :  { %730 = vmatprep.subr.mxu0 %v1128_v0  ;;  %761 = vmatprep.subr.mxu1 %v1128_v0  ;;  %v265_v24 = vld [vmem:[#allocation8 + $0x48] sm:$0xff]  ;;  %v264_v25 = vld [vmem:[#allocation8 + $0x40] sm:$0xff]  ;;  %v263_v26 = vld [vmem:[#allocation8 + $0x38] sm:$0xff]  ;;  %p1033_p11 = pnand %p1032_p10, %p1026_p7 }
  0x5f   :  { %731 = vmatpush3.msra.mxu0 %v145_v4  ;;  %762 = vmatpush3.msra.mxu1 %v270_v19  ;;  %v262_v27 = vld [vmem:[#allocation8 + $0x30] sm:$0xff]  ;;  %v261_v28 = vld [vmem:[#allocation8 + $0x28] sm:$0xff]  ;;  %v260_v29 = vld [vmem:[#allocation8 + $0x20] sm:$0xff] }
  0x60   :  { %732 = vmatprep.subr.mxu0 %v1128_v0  ;;  %763 = vmatprep.subr.mxu1 %v1128_v0  ;;  %v259_v30 = vld [vmem:[#allocation8 + $0x18] sm:$0xff]  ;;  %v258_v31 = vld [vmem:[#allocation8 + $0x10] sm:$0xff]  ;;  %v257_v32 = vld [vmem:[#allocation8 + $0x8] sm:$0xff] }
  0x61   :  { %733 = vmatpush3.msra.mxu0 %v144_v5  ;;  %764 = vmatpush3.msra.mxu1 %v269_v20  ;;  %v256_v33 = vld [vmem:[#allocation8] sm:$0xff]  ;;  %v132_v37 = vld [vmem:[#allocation7] sm:$0x7]  ;;  %v380_v18 = vld [vmem:[#allocation10 + $0x10] sm:$0xff] }
  0x62   :  { %734 = vmatprep.subr.mxu0 %v1128_v0  ;;  %765 = vmatprep.subr.mxu1 %v1128_v0  ;;  %v152_v38 = vrot.slane %v132_v37, %v1277_v36  ;;  %v252_v2 = vrot.slane %v132_v37, %v1282_v61  ;;  %v393_v5 = vld [vmem:[#allocation10 + $0x78] sm:$0xff]  ;;  %v379_v19 = vld [vmem:[#allocation10 + $0x8] sm:$0xff]  ;;  %v378_v20 = vld [vmem:[#allocation10] sm:$0xff] }
  0x63   :  { %735 = vmatpush3.msra.mxu0 %v143_v6  ;;  %766 = vmatpush3.msra.mxu1 %v268_v21  ;;  %v392_v6 = vld [vmem:[#allocation10 + $0x70] sm:$0xff] }
  0x64   :  { %736 = vmatprep.subr.mxu0 %v1128_v0  ;;  %767 = vmatprep.subr.mxu1 %v1128_v0  ;;  %v255_v21 = vld [vmem:[%s1349_s4] sm:$0x7] }
  0x65   :  { %737 = vmatpush3.msra.mxu0 %v142_v7  ;;  %768 = vmatpush3.msra.mxu1 %v267_v22  ;;  %v391_v7 = vld [vmem:[#allocation10 + $0x68] sm:$0xff]  ;;  %v275_v22 = vrot.slane %v255_v21, %v1277_v36 }
  0x66   :  { %738 = vmatprep.subr.mxu0 %v1128_v0  ;;  %769 = vmatprep.subr.mxu1 %v1128_v0 }
  0x67   :  { %739 = vmatpush3.msra.mxu0 %v141_v8  ;;  %770 = vmatpush3.msra.mxu1 %v266_v23  ;;  %v390_v8 = vld [vmem:[#allocation10 + $0x60] sm:$0xff] }
  0x68   :  { %740 = vmatprep.subr.mxu0 %v1128_v0  ;;  %771 = vmatprep.subr.mxu1 %v1128_v0 }
  0x69   :  { %741 = vmatpush3.msra.mxu0 %v140_v9  ;;  %772 = vmatpush3.msra.mxu1 %v265_v24  ;;  %v389_v9 = vld [vmem:[#allocation10 + $0x58] sm:$0xff] }
  0x6a   :  { %742 = vmatprep.subr.mxu0 %v1128_v0  ;;  %773 = vmatprep.subr.mxu1 %v1128_v0 }
  0x6b   :  { %743 = vmatpush3.msra.mxu0 %v139_v10  ;;  %774 = vmatpush3.msra.mxu1 %v264_v25  ;;  %v388_v10 = vld [vmem:[#allocation10 + $0x50] sm:$0xff] }
  0x6c   :  { %744 = vmatprep.subr.mxu0 %v1128_v0  ;;  %775 = vmatprep.subr.mxu1 %v1128_v0 }
  0x6d   :  { %745 = vmatpush3.msra.mxu0 %v138_v11  ;;  %776 = vmatpush3.msra.mxu1 %v263_v26  ;;  %v387_v11 = vld [vmem:[#allocation10 + $0x48] sm:$0xff] }
  0x6e   :  { %746 = vmatprep.subr.mxu0 %v1128_v0  ;;  %777 = vmatprep.subr.mxu1 %v1128_v0 }
  0x6f   :  { %747 = vmatpush3.msra.mxu0 %v137_v12  ;;  %778 = vmatpush3.msra.mxu1 %v262_v27  ;;  %v386_v12 = vld [vmem:[#allocation10 + $0x40] sm:$0xff] }
  0x70   :  { %748 = vmatprep.subr.mxu0 %v1128_v0  ;;  %779 = vmatprep.subr.mxu1 %v1128_v0 }
  0x71   :  { %749 = vmatpush3.msra.mxu0 %v136_v13  ;;  %780 = vmatpush3.msra.mxu1 %v261_v28  ;;  %v385_v13 = vld [vmem:[#allocation10 + $0x38] sm:$0xff] }
  0x72   :  { %750 = vmatprep.subr.mxu0 %v1128_v0  ;;  %781 = vmatprep.subr.mxu1 %v1128_v0 }
  0x73   :  { %751 = vmatpush3.msra.mxu0 %v135_v14  ;;  %782 = vmatpush3.msra.mxu1 %v260_v29  ;;  %v384_v14 = vld [vmem:[#allocation10 + $0x30] sm:$0xff] }
  0x74   :  { %752 = vmatprep.subr.mxu0 %v1128_v0  ;;  %783 = vmatprep.subr.mxu1 %v1128_v0 }
  0x75   :  { %753 = vmatpush3.msra.mxu0 %v134_v15  ;;  %784 = vmatpush3.msra.mxu1 %v259_v30  ;;  %v383_v15 = vld [vmem:[#allocation10 + $0x28] sm:$0xff] }
  0x76   :  { %754 = vmatprep.subr.mxu0 %v1128_v0  ;;  %785 = vmatprep.subr.mxu1 %v1128_v0 }
  0x77   :  { %755 = vmatpush3.msra.mxu0 %v133_v16  ;;  %786 = vmatpush3.msra.mxu1 %v258_v31  ;;  %v382_v16 = vld [vmem:[#allocation10 + $0x20] sm:$0xff] }
  0x78   :  { %757 = vmatmul.mubr.f32.vlgmr.msra.gmra.mxu0 %v131_v17  ;;  %794 = vmatprep.subr.mxu0 %v1128_v0  ;;  %v381_v17 = vld [vmem:[#allocation10 + $0x18] sm:$0xff] }
  0x79   :  { %826 = vmatprep.mubr.msk.f32.mxu0 %vm1129_vm0, %v1128_v0  ;;  %787 = vmatprep.subr.mxu1 %v1128_v0 }
  0x7a   :  { %788 = vmatpush3.msra.mxu1 %v257_v32  ;;  %795 = vmatpush3.msra.mxu0 %v393_v5  ;;  %v501_v5 = vld [vmem:[#allocation11] sm:$0xff] }
  0x7b   :  { %789 = vmatprep.subr.mxu1 %v1128_v0  ;;  %796 = vmatprep.subr.mxu0 %v1128_v0 }
  0x7c   :  { %790 = vmatpush3.msra.mxu1 %v256_v33  ;;  %797 = vmatpush3.msra.mxu0 %v392_v6  ;;  %v377_v6 = vld [vmem:[%s1351_s6] sm:$0x7] }
  0x7d   :  { %829 = vmatprep.subr.mxu1 %v1128_v0  ;;  %798 = vmatprep.subr.mxu0 %v1128_v0 }
  0x7e   :  { %799 = vmatpush3.msra.mxu0 %v391_v7  ;;  %v397_v7 = vrot.slane %v377_v6, %v1277_v36 }
  0x7f   :  { %800 = vmatprep.subr.mxu0 %v1128_v0 }
  0x80   :  { %801 = vmatpush3.msra.mxu0 %v390_v8 }
  0x81   :  { %802 = vmatprep.subr.mxu0 %v1128_v0 }
  0x82   :  { %803 = vmatpush3.msra.mxu0 %v389_v9 }
  0x83   :  { %804 = vmatprep.subr.mxu0 %v1128_v0 }
  0x84   :  { %805 = vmatpush3.msra.mxu0 %v388_v10 }
  0x85   :  { %806 = vmatprep.subr.mxu0 %v1128_v0 }
  0x86   :  { %807 = vmatpush3.msra.mxu0 %v387_v11 }
  0x87   :  { %808 = vmatprep.subr.mxu0 %v1128_v0 }
  0x88   :  { %809 = vmatpush3.msra.mxu0 %v386_v12 }
  0x89   :  { %810 = vmatprep.subr.mxu0 %v1128_v0 }
  0x8a   :  { %811 = vmatpush3.msra.mxu0 %v385_v13 }
  0x8b   :  { %812 = vmatprep.subr.mxu0 %v1128_v0 }
  0x8c   :  { %813 = vmatpush3.msra.mxu0 %v384_v14 }
  0x8d   :  { %814 = vmatprep.subr.mxu0 %v1128_v0 }
  0x8e   :  { %815 = vmatpush3.msra.mxu0 %v383_v15 }
  0x8f   :  { %816 = vmatprep.subr.mxu0 %v1128_v0 }
  0x90   :  { %817 = vmatpush3.msra.mxu0 %v382_v16 }
  0x91   :  { %818 = vmatprep.subr.mxu0 %v1128_v0 }
  0x92   :  { %819 = vmatpush3.msra.mxu0 %v381_v17 }
  0x93   :  { %820 = vmatprep.subr.mxu0 %v1128_v0 }
  0x94   :  { %821 = vmatpush3.msra.mxu0 %v380_v18 }
  0x95   :  { %822 = vmatprep.subr.mxu0 %v1128_v0 }
  0x96   :  { %823 = vmatpush3.msra.mxu0 %v379_v19 }
  0x97   :  { %824 = vmatprep.subr.mxu0 %v1128_v0 }
  0x98   :  { %825 = vmatpush3.msra.mxu0 %v378_v20 }
 0x138   :  { %v219_v39 = vpop.f32.mrf.mxu0 }
 0x139   :  { %v220_v40 = vadd.f32 %v219_v39, %v152_v38 }
 0x13a   :  { %v758_v41 = vpop.f32.mrf.mxu0 }
 0x13b   :  { %v223_v42 = vmax.f32 %v220_v40, 0.0 }
 0x13d   :  { %v224_v43 = vrot.slane %v223_v42, 4 }
 0x13f   :  { %v225_v44 = vadd.f32 %v224_v43, %v223_v42 }
 0x141   :  { %v226_v45 = vrot.slane %v225_v44, 2 }
 0x143   :  { %v227_v46 = vadd.f32 %v226_v45, %v225_v44 }
 0x145   :  { %v228_v47 = vrot.slane %v227_v46, 1 }
 0x147   :  { %v229_v48 = vadd.f32 %v228_v47, %v227_v46 }
 0x149   :  { %v231_v49 = vmul.f32 0.125, %v229_v48  ;;  %v374_v48 = vrot.slane %v255_v21, %v1282_v61 }
 0x14b   :  { %v232_v50 = vsub.f32 %v223_v42, %v231_v49 }
 0x14d   :  { %v233_v51 = vmul.f32 %v232_v50, %v232_v50 }
 0x14f   :  { %v234_v52 = vrot.slane %v233_v51, 4 }
 0x151   :  { %v235_v53 = vadd.f32 %v234_v52, %v233_v51  ;;  %v516_v51 = vld [vmem:[#allocation11 + $0x78] sm:$0xff]  ;;  %v515_v52 = vld [vmem:[#allocation11 + $0x70] sm:$0xff] }
 0x153   :  { %v236_v54 = vrot.slane %v235_v53, 2 }
 0x155   :  { %v237_v55 = vadd.f32 %v236_v54, %v235_v53  ;;  %v514_v53 = vld [vmem:[#allocation11 + $0x68] sm:$0xff]  ;;  %v513_v54 = vld [vmem:[#allocation11 + $0x60] sm:$0xff] }
 0x157   :  { %v238_v56 = vrot.slane %v237_v55, 1 }
 0x159   :  { %v239_v57 = vadd.f32 %v238_v56, %v237_v55  ;;  %v512_v55 = vld [vmem:[#allocation11 + $0x58] sm:$0xff]  ;;  %v511_v56 = vld [vmem:[#allocation11 + $0x50] sm:$0xff] }
 0x15b   :  { %v240_v58 = vmul.f32 0.125, %v239_v57  ;;  %v510_v57 = vld [vmem:[#allocation11 + $0x48] sm:$0xff] }
 0x15d   :  { %v241_v59 = vadd.f32 1e-05, %v240_v58  ;;  %v509_v58 = vld [vmem:[#allocation11 + $0x40] sm:$0xff] }
 0x15f   :  { %879 = vrsqrt.f32 %v241_v59  ;;  %v508_v59 = vld [vmem:[#allocation11 + $0x38] sm:$0xff] }
 0x16c   :  { %v880_v62 = vpop.eup %879 }
 0x16d   :  { %v243_v63 = vmul.f32 %v880_v62, %v132_v37  ;;  %v507_v62 = vld [vmem:[#allocation11 + $0x30] sm:$0xff] }
 0x16f   :  { %v247_v1 = vrot.slane %v243_v63, %v1280_v60  ;;  %v506_v63 = vld [vmem:[#allocation11 + $0x28] sm:$0xff] }
 0x171   :  { %v248_v3 = vmul.f32 %v247_v1, %v232_v50  ;;  %v505_v1 = vld [vmem:[#allocation11 + $0x20] sm:$0xff] }
 0x173   :  { %v253_v4 = vadd.f32 %v252_v2, %v248_v3  ;;  %v504_v2 = vld [vmem:[#allocation11 + $0x18] sm:$0xff]  ;;  %v503_v3 = vld [vmem:[#allocation11 + $0x10] sm:$0xff] }
 0x175   :  { %792 = vmatmul.mubr.f32.vlgmr.msra.gmra.mxu1 %v253_v4  ;;  %254 = vst [vmem:[#allocation14] sm:$0xff] %v253_v4  ;;  %v502_v4 = vld [vmem:[#allocation11 + $0x8] sm:$0xff] }
 0x176   :  { %861 = vmatprep.mubr.msk.f32.mxu1 %vm1129_vm0, %v1128_v0  ;;  %830 = vmatpush3.msra.mxu1 %v516_v51 }
 0x177   :  { %831 = vmatprep.subr.mxu1 %v1128_v0 }
 0x178   :  { %832 = vmatpush3.msra.mxu1 %v515_v52 }
 0x179   :  { %833 = vmatprep.subr.mxu1 %v1128_v0 }
 0x17a   :  { %834 = vmatpush3.msra.mxu1 %v514_v53 }
 0x17b   :  { %835 = vmatprep.subr.mxu1 %v1128_v0 }
 0x17c   :  { %836 = vmatpush3.msra.mxu1 %v513_v54 }
 0x17d   :  { %837 = vmatprep.subr.mxu1 %v1128_v0 }
 0x17e   :  { %838 = vmatpush3.msra.mxu1 %v512_v55 }
 0x17f   :  { %839 = vmatprep.subr.mxu1 %v1128_v0 }
 0x180   :  { %840 = vmatpush3.msra.mxu1 %v511_v56 }
 0x181   :  { %841 = vmatprep.subr.mxu1 %v1128_v0 }
 0x182   :  { %842 = vmatpush3.msra.mxu1 %v510_v57 }
 0x183   :  { %843 = vmatprep.subr.mxu1 %v1128_v0 }
 0x184   :  { %844 = vmatpush3.msra.mxu1 %v509_v58 }
 0x185   :  { %845 = vmatprep.subr.mxu1 %v1128_v0 }
 0x186   :  { %846 = vmatpush3.msra.mxu1 %v508_v59 }
 0x187   :  { %847 = vmatprep.subr.mxu1 %v1128_v0 }
 0x188   :  { %848 = vmatpush3.msra.mxu1 %v507_v62 }
 0x189   :  { %849 = vmatprep.subr.mxu1 %v1128_v0 }
 0x18a   :  { %850 = vmatpush3.msra.mxu1 %v506_v63 }
 0x18b   :  { %851 = vmatprep.subr.mxu1 %v1128_v0 }
 0x18c   :  { %852 = vmatpush3.msra.mxu1 %v505_v1 }
 0x18d   :  { %853 = vmatprep.subr.mxu1 %v1128_v0 }
 0x18e   :  { %854 = vmatpush3.msra.mxu1 %v504_v2 }
 0x18f   :  { %855 = vmatprep.subr.mxu1 %v1128_v0 }
 0x190   :  { %856 = vmatpush3.msra.mxu1 %v503_v3 }
 0x191   :  { %857 = vmatprep.subr.mxu1 %v1128_v0 }
 0x192   :  { %858 = vmatpush3.msra.mxu1 %v502_v4 }
 0x193   :  { %859 = vmatprep.subr.mxu1 %v1128_v0 }
 0x194   :  { %860 = vmatpush3.msra.mxu1 %v501_v5 }
 0x235   :  { %v342_v23 = vpop.f32.mrf.mxu1 }
 0x236   :  { %v343_v24 = vadd.f32 %v342_v23, %v275_v22 }
 0x237   :  { %v793_v25 = vpop.f32.mrf.mxu1 }
 0x238   :  { %v346_v26 = vmax.f32 %v343_v24, 0.0 }
 0x23a   :  { %v347_v27 = vrot.slane %v346_v26, 4 }
 0x23c   :  { %v348_v28 = vadd.f32 %v347_v27, %v346_v26 }
 0x23e   :  { %v349_v29 = vrot.slane %v348_v28, 2 }
 0x240   :  { %v350_v30 = vadd.f32 %v349_v29, %v348_v28 }
 0x242   :  { %v351_v31 = vrot.slane %v350_v30, 1 }
 0x244   :  { %v352_v32 = vadd.f32 %v351_v31, %v350_v30  ;;  %v496_v30 = vrot.slane %v377_v6, %v1282_v61 }
 0x246   :  { %v353_v33 = vmul.f32 0.125, %v352_v32  ;;  %v499_v32 = vld [vmem:[%s1354_s9] sm:$0xff] }
 0x248   :  { %v354_v34 = vsub.f32 %v346_v26, %v353_v33 }
 0x24a   :  { %v355_v35 = vmul.f32 %v354_v34, %v354_v34 }
 0x24c   :  { %v356_v37 = vrot.slane %v355_v35, 4 }
 0x24e   :  { %v357_v38 = vadd.f32 %v356_v37, %v355_v35 }
 0x250   :  { %v358_v39 = vrot.slane %v357_v38, 2 }
 0x252   :  { %v359_v40 = vadd.f32 %v358_v39, %v357_v38 }
 0x254   :  { %v360_v41 = vrot.slane %v359_v40, 1 }
 0x256   :  { %v361_v42 = vadd.f32 %v360_v41, %v359_v40 }
 0x258   :  { %v362_v43 = vmul.f32 0.125, %v361_v42 }
 0x25a   :  { %v363_v44 = vadd.f32 1e-05, %v362_v43 }
 0x25c   :  { %881 = vrsqrt.f32 %v363_v44 }
 0x269   :  { %v882_v45 = vpop.eup %881 }
 0x26a   :  { %v365_v46 = vmul.f32 %v882_v45, %v255_v21 }
 0x26c   :  { %v369_v47 = vrot.slane %v365_v46, %v1280_v60 }
 0x26e   :  { %v370_v49 = vmul.f32 %v369_v47, %v354_v34 }
 0x270   :  { %v375_v50 = vadd.f32 %v374_v48, %v370_v49 }
 0x272   :  { %827 = vmatmul.mubr.f32.vlgmr.msra.gmra.mxu0 %v375_v50  ;;  %376 = vst [vmem:[#allocation15] sm:$0xff] %v375_v50 }
 0x332   :  { %v464_v8 = vpop.f32.mrf.mxu0 }
 0x333   :  { %v465_v9 = vadd.f32 %v464_v8, %v397_v7 }
 0x334   :  { %v828_v10 = vpop.f32.mrf.mxu0 }
 0x335   :  { %v468_v11 = vmax.f32 %v465_v9, 0.0 }
 0x337   :  { %v469_v12 = vrot.slane %v468_v11, 4 }
 0x339   :  { %v470_v13 = vadd.f32 %v469_v12, %v468_v11 }
 0x33b   :  { %v471_v14 = vrot.slane %v470_v13, 2 }
 0x33d   :  { %v472_v15 = vadd.f32 %v471_v14, %v470_v13 }
 0x33f   :  { %v473_v16 = vrot.slane %v472_v15, 1 }
 0x341   :  { %v474_v17 = vadd.f32 %v473_v16, %v472_v15 }
 0x343   :  { %v475_v18 = vmul.f32 0.125, %v474_v17 }
 0x345   :  { %v476_v0 = vsub.f32 %v468_v11, %v475_v18 }
 0x347   :  { %v477_v19 = vmul.f32 %v476_v0, %v476_v0 }
 0x349   :  { %v478_v20 = vrot.slane %v477_v19, 4 }
 0x34b   :  { %v479_v21 = vadd.f32 %v478_v20, %v477_v19 }
 0x34d   :  { %v480_v22 = vrot.slane %v479_v21, 2 }
 0x34f   :  { %v481_v23 = vadd.f32 %v480_v22, %v479_v21 }
 0x351   :  { %v482_v24 = vrot.slane %v481_v23, 1 }
 0x353   :  { %v483_v25 = vadd.f32 %v482_v24, %v481_v23 }
 0x355   :  { %v484_v36 = vmul.f32 0.125, %v483_v25 }
 0x357   :  { %v485_v26 = vadd.f32 1e-05, %v484_v36 }
 0x359   :  { %883 = vrsqrt.f32 %v485_v26 }
 0x366   :  { %v884_v27 = vpop.eup %883 }
 0x367   :  { %v487_v28 = vmul.f32 %v884_v27, %v377_v6 }
 0x369   :  { %v491_v29 = vrot.slane %v487_v28, %v1280_v60 }
 0x36b   :  { %v492_v31 = vmul.f32 %v491_v29, %v476_v0 }
 0x36d   :  { %v497_v33 = vadd.f32 %v496_v30, %v492_v31 }
 0x36f   :  { %498 = vst [vmem:[#allocation17] sm:$0xff] %v497_v33  ;;  %v500_v34 = vmul.f32 %v499_v32, %v497_v33 }
 0x371   :  { %862 = vmatmul.mubr.f32.vlgmr.msra.gmra.mxu1 %v500_v34 }
 0x372   :  { %1036 = shalt.err (!%p1033_p11)
}
 0x373   :  { %615 = dma.vmem_to_hbm [thread:$0]  %s613_s26, 128, %s1356_s11, [#allocation16]  }
 0x374   :  { %s1045_s9 = scalar_lea.vmem %s603_s27, 128  ;;  %p1050_p13 = scmp.lt.s32.totalorder %s603_s27, %s603_s27 }
 0x375   :  { %p1046_p12 = scmp.ne.s32.totalorder %s603_s27, %s1045_s9  ;;  %p1051_p0 = scmp.lt.s32.totalorder %s1045_s9, %s1045_s9 }
 0x377   :  { %p1052_p1 = por %p1051_p0, %p1050_p13 }
 0x379   :  { %p1053_p2 = pnand %p1052_p1, %p1046_p12 }
 0x37b   :  { %1056 = shalt.err (!%p1053_p2)
}
 0x37c   :  { %605 = dma.vmem_to_hbm [thread:$0]  %s603_s27, 128, %s1355_s10, [#allocation4]  }
 0x37d   :  { %s1132_s17 = smov [#allocation17]  }
 0x37e   :  { %s622_s18 = sshll.u32 %s1132_s17, 4  ;;  %s623_s18 = int_to_ptr.vmem [resolvable:$true] %s622_s18 }
 0x37f   :  { %s1065_s19 = scalar_lea.vmem %s623_s18, 128  ;;  %p1070_p4 = scmp.lt.s32.totalorder %s623_s18, %s623_s18 }
 0x380   :  { %p1066_p3 = scmp.ne.s32.totalorder %s623_s18, %s1065_s19  ;;  %p1071_p5 = scmp.lt.s32.totalorder %s1065_s19, %s1065_s19 }
 0x382   :  { %p1072_p6 = por %p1071_p5, %p1070_p4 }
 0x384   :  { %p1073_p7 = pnand %p1072_p6, %p1066_p3 }
 0x386   :  { %1076 = shalt.err (!%p1073_p7)
}
 0x387   :  { %625 = dma.vmem_to_hbm [thread:$0]  %s623_s18, 128, %s1357_s12, [#allocation16]   ;;  %v655_v60 = vld [vmem:[#allocation13] ss:$0 sm:$0xff] }
 0x388   :  { %s1133_s21 = smov [#allocation18]  }
 0x389   :  { %s632_s0 = sshll.u32 %s1133_s21, 4  ;;  %s633_s0 = int_to_ptr.vmem [resolvable:$true] %s632_s0 }
 0x38a   :  { %s1085_s10 = scalar_lea.vmem %s633_s0, 128  ;;  %p1090_p9 = scmp.lt.s32.totalorder %s633_s0, %s633_s0 }
 0x38b   :  { %p1086_p8 = scmp.ne.s32.totalorder %s633_s0, %s1085_s10  ;;  %p1091_p10 = scmp.lt.s32.totalorder %s1085_s10, %s1085_s10 }
 0x38d   :  { %p1092_p11 = por %p1091_p10, %p1090_p9 }
 0x38f   :  { %p1093_p12 = pnand %p1092_p11, %p1086_p8 }
 0x431   :  { %v590_v61 = vpop.f32.mrf.mxu1 }
 0x432   :  { %v591_v35 = vadd.f32 %v655_v60, %v590_v61 }
 0x433   :  { %v863_v37 = vpop.f32.mrf.mxu1 }
 0x434   :  { %v594_v38 = vmax.f32 %v591_v35, 0.0 }
 0x436   :  { %595 = vst [vmem:[#allocation18] sm:$0xff] %v594_v38 }
 0x437   :  { %1096 = shalt.err (!%p1093_p12)
}
 0x438   :  { %635 = dma.vmem_to_hbm [thread:$0]  %s633_s0, 128, %s1358_s13, [#allocation19]  }
 0x439   :  { %1113 = dma.done.wait [#allocation4], 128  }
 0x43a   :  { %1114 = vsyncadd [#allocation4], 4294967168 }
 0x43b   :  { %1115 = dma.done.wait [#allocation16], 256  }
 0x43c   :  { %1116 = vsyncadd [#allocation16], 4294967040 }
 0x43d   :  { %1117 = dma.done.wait [#allocation19], 128  }
 0x43e   :  { %1118 = vsyncadd [#allocation19], 4294967168 }
 0x43f   :  { %648 = vsyncpa [#allocation3], 1 }
 0x440   :  { %649 = vsyncpa [#allocation6], 1 }
 0x441   :  { %650 = vsyncpa [#allocation9], 1 }
 0x442   :  { %651 = vsyncpa [#allocation12], 1 }
 0x443   :  { %652 = vsyncpa [#allocation4], 1 }
 0x444   :  { %653 = vsyncpa [#allocation16], 1 }
 0x445   :  { %654 = vsyncpa [#allocation19], 1 }

</bundles_post_ra>
